<compile_context>
chip_gen: v6e
topology: v6e:2x2x1
jax: 0.10.0
libtpu: 0.0.40
codegen_flags: <defaults>
</compile_context>

<pallas_src>
import jax
import jax.numpy as jnp
from jax.experimental import pallas as pl
from jax.experimental.pallas import tpu as pltpu

LANE = 128            # TPU vreg lane width
DEFAULT_TILE_B = 8192  # amortizes per-step overhead; ~2.6 MiB VMEM at f32


def _round_up(v, m):
    return ((v + m - 1) // m) * m


def mlp_kernel(x_ref, w1_ref, b1_ref, w2_ref, b2_ref, w3_ref, b3_ref, o_ref):
    # x_ref: (1, TB) f32 — batch on lanes.
    x = x_ref[...]

    # Layer 1: Linear(1, 20).  K=1 -> broadcast outer product on the VPU.
    #   (20,1) * (1,TB) + (20,1) -> (20,TB)
    h1 = jnp.tanh(w1_ref[...] * x + b1_ref[...])

    # Layer 2: Linear(20, 20) on the MXU, f32 accumulation.
    #   (20,20) @ (20,TB) -> (20,TB)
    h2 = jnp.tanh(
        jnp.dot(w2_ref[...], h1, preferred_element_type=jnp.float32) + b2_ref[...]
    )

    # Layer 3: Linear(20, 1) as a row-matmul on the (otherwise idle) MXU
    # instead of a cross-sublane reduce: (1,20) @ (20,TB) -> (1,TB).
    out = jnp.dot(w3_ref[...], h2, preferred_element_type=jnp.float32) + b3_ref[...]

    o_ref[...] = out.astype(o_ref.dtype)


def mlp_forward(x, params, tile_b=DEFAULT_TILE_B):
    """x: (B, 1) float32. Returns (B, 1) float32."""
    w1, b1, w2, b2, w3r, b3 = params
    B = x.shape[0]

    # (B,1) -> (1,B): pure reshape, no copy, no pad.
    xt = x.reshape(1, B)

    if B <= LANE:
        # Tiny batch: one block equal to the full array dims (always legal).
        tb = B
    else:
        # Multiple of 128 lanes; cap so the grid has >= 2 steps (v7x megacore)
        # and at tile_b so the per-step VMEM footprint stays small.
        half = _round_up(pl.cdiv(B, 2), LANE)
        tb = max(LANE, min(_round_up(min(tile_b, half), LANE), half))
    grid = (pl.cdiv(B, tb),)

    out_t = pl.pallas_call(
        mlp_kernel,
        out_shape=jax.ShapeDtypeStruct((1, B), x.dtype),
        grid=grid,
        in_specs=[
            pl.BlockSpec((1, tb), lambda i: (0, i)),     # x^T batch tile
            pl.BlockSpec(w1.shape, lambda i: (0, 0)),     # W1  (20,1)  VMEM-resident
            pl.BlockSpec(b1.shape, lambda i: (0, 0)),     # b1  (20,1)  VMEM-resident
            pl.BlockSpec(w2.shape, lambda i: (0, 0)),     # W2  (20,20) VMEM-resident
            pl.BlockSpec(b2.shape, lambda i: (0, 0)),     # b2  (20,1)  VMEM-resident
            pl.BlockSpec(w3r.shape, lambda i: (0, 0)),    # W3  (1,20)  VMEM-resident
            pl.BlockSpec(b3.shape, lambda i: (0, 0)),     # b3  (1,1)   VMEM-resident
        ],
        out_specs=pl.BlockSpec((1, tb), lambda i: (0, i)),
        compiler_params=pltpu.CompilerParams(
            dimension_semantics=("parallel",),
        ),
    )(xt, w1, b1, w2, b2, w3r, b3)

    # (1,B) -> (B,1): pure reshape, no copy.
    return out_t.reshape(B, 1)


def init_params(key):
    """Deterministic init mimicking nn.Linear's U(-1/sqrt(fan_in), 1/sqrt(fan_in)).

    Stored in kernel-friendly column form:
      W1 (20,1), b1 (20,1), W2 (20,20), b2 (20,1), W3 (1,20) row, b3 (1,1).
    """
    def linear_col(key, fan_in, fan_out):
        kw, kb = jax.random.split(key)
        bound = 1.0 / jnp.sqrt(jnp.float32(fan_in))
        w = jax.random.uniform(kw, (fan_out, fan_in), jnp.float32, -bound, bound)
        b = jax.random.uniform(kb, (fan_out, 1), jnp.float32, -bound, bound)
        return w, b

    k1, k2, k3 = jax.random.split(key, 3)
    w1, b1 = linear_col(k1, 1, 20)      # PyTorch W1 is (20,1)
    w2, b2 = linear_col(k2, 20, 20)     # PyTorch W2 is (20,20)
    w3, b3 = linear_col(k3, 20, 1)      # PyTorch W3 is (1,20) — kept as a row
    return (w1, b1, w2, b2, w3, b3)


def reference_forward(x, params):
    """Pure-JAX reference in the original PyTorch (row-major) convention."""
    w1, b1, w2, b2, w3r, b3 = params
    h1 = jnp.tanh(x @ w1.T + b1.T)      # (B,1)@(1,20)  + (1,20)
    h2 = jnp.tanh(h1 @ w2.T + b2.T)     # (B,20)@(20,20) + (1,20)
    return h2 @ w3r.T + b3              # (B,20)@(20,1)  + (1,1)


if __name__ == "__main__":
    key = jax.random.PRNGKey(0)
    k_params, k_x = jax.random.split(key)

    params = init_params(k_params)

    # Spec's input: x_array = [[2.0], [5.0]]  -> batch=2, in_features=1.
    x_small = jnp.array([[2.0], [5.0]], dtype=jnp.float32)
    out_small = jax.block_until_ready(mlp_forward(x_small, params))
    ref_small = reference_forward(x_small, params)
    assert out_small.shape == (2, 1)
    assert jnp.allclose(out_small, ref_small, atol=1e-5, rtol=1e-5)

    # Larger, non-128-multiple batch exercises the multi-tile ragged-edge path
    # (>= 2 grid steps -> both TCs busy on v7x) with no wrapper pad/slice.
    x_big = jax.random.normal(k_x, (1000, 1), jnp.float32)
    out_big = jax.block_until_ready(mlp_forward(x_big, params))
    ref_big = reference_forward(x_big, params)
    assert out_big.shape == (1000, 1)
    assert jnp.allclose(out_big, ref_big, atol=1e-5, rtol=1e-5)

    print("KERNEL_OK")
</pallas_src>

<mosaic_0001>
module attributes {stable_mosaic.version = 11 : i64} {
  func.func @mlp_kernel(%arg0: i32, %arg1: memref<1x2xf32, #tpu.memory_space<vmem>>, %arg2: memref<20x1xf32, #tpu.memory_space<vmem>>, %arg3: memref<20x1xf32, #tpu.memory_space<vmem>>, %arg4: memref<20x20xf32, #tpu.memory_space<vmem>>, %arg5: memref<20x1xf32, #tpu.memory_space<vmem>>, %arg6: memref<1x20xf32, #tpu.memory_space<vmem>>, %arg7: memref<1x1xf32, #tpu.memory_space<vmem>>, %arg8: memref<1x2xf32, #tpu.memory_space<vmem>>) attributes {dimension_semantics = [#tpu.dimension_semantics<parallel>], iteration_bounds = array<i64: 1>, scalar_prefetch = 0 : i64, scratch_operands = 0 : i64, tpu.core_type = #tpu.core_type<tc>, window_params = [{transform_indices = @transform_0, window_bounds = array<i64: 1, 2>}, {pipeline_mode = #tpu.pipeline_mode<synchronous>, transform_indices = @transform_1, window_bounds = array<i64: 20, 1>}, {pipeline_mode = #tpu.pipeline_mode<synchronous>, transform_indices = @transform_2, window_bounds = array<i64: 20, 1>}, {pipeline_mode = #tpu.pipeline_mode<synchronous>, transform_indices = @transform_3, window_bounds = array<i64: 20, 20>}, {pipeline_mode = #tpu.pipeline_mode<synchronous>, transform_indices = @transform_4, window_bounds = array<i64: 20, 1>}, {pipeline_mode = #tpu.pipeline_mode<synchronous>, transform_indices = @transform_5, window_bounds = array<i64: 1, 20>}, {pipeline_mode = #tpu.pipeline_mode<synchronous>, transform_indices = @transform_6, window_bounds = array<i64: 1, 1>}, {transform_indices = @transform_7, window_bounds = array<i64: 1, 2>}]} {
    %c0 = arith.constant 0 : index
    %c0_0 = arith.constant 0 : index
    %0 = vector.load %arg1[%c0, %c0_0] : memref<1x2xf32, #tpu.memory_space<vmem>>, vector<1x2xf32>
    %c0_1 = arith.constant 0 : index
    %c0_2 = arith.constant 0 : index
    %1 = vector.load %arg2[%c0_1, %c0_2] : memref<20x1xf32, #tpu.memory_space<vmem>>, vector<20x1xf32>
    %2 = vector.broadcast %1 : vector<20x1xf32> to vector<20x2xf32>
    %3 = vector.broadcast %0 : vector<1x2xf32> to vector<20x2xf32>
    %4 = arith.mulf %2, %3 : vector<20x2xf32>
    %c0_3 = arith.constant 0 : index
    %c0_4 = arith.constant 0 : index
    %5 = vector.load %arg3[%c0_3, %c0_4] : memref<20x1xf32, #tpu.memory_space<vmem>>, vector<20x1xf32>
    %6 = vector.broadcast %5 : vector<20x1xf32> to vector<20x2xf32>
    %7 = arith.addf %4, %6 : vector<20x2xf32>
    %8 = math.tanh %7 : vector<20x2xf32>
    %c0_5 = arith.constant 0 : index
    %c0_6 = arith.constant 0 : index
    %9 = vector.load %arg4[%c0_5, %c0_6] : memref<20x20xf32, #tpu.memory_space<vmem>>, vector<20x20xf32>
    %cst = arith.constant dense<0.000000e+00> : vector<20x2xf32>
    %10 = tpu.matmul %9, %8, %cst {dimension_numbers = #tpu.dot_dimension_numbers<[1], [0], [0], [1], [0, 0, 1, 1], [], []>} : vector<20x20xf32>, vector<20x2xf32>, vector<20x2xf32> -> vector<20x2xf32>
    %c0_7 = arith.constant 0 : index
    %c0_8 = arith.constant 0 : index
    %11 = vector.load %arg5[%c0_7, %c0_8] : memref<20x1xf32, #tpu.memory_space<vmem>>, vector<20x1xf32>
    %12 = vector.broadcast %11 : vector<20x1xf32> to vector<20x2xf32>
    %13 = arith.addf %10, %12 : vector<20x2xf32>
    %14 = math.tanh %13 : vector<20x2xf32>
    %c0_9 = arith.constant 0 : index
    %c0_10 = arith.constant 0 : index
    %15 = vector.load %arg6[%c0_9, %c0_10] : memref<1x20xf32, #tpu.memory_space<vmem>>, vector<1x20xf32>
    %cst_11 = arith.constant dense<0.000000e+00> : vector<1x2xf32>
    %16 = tpu.matmul %15, %14, %cst_11 {dimension_numbers = #tpu.dot_dimension_numbers<[1], [0], [0], [1], [0, 0, 1, 1], [], []>} : vector<1x20xf32>, vector<20x2xf32>, vector<1x2xf32> -> vector<1x2xf32>
    %c0_12 = arith.constant 0 : index
    %c0_13 = arith.constant 0 : index
    %17 = vector.load %arg7[%c0_12, %c0_13] : memref<1x1xf32, #tpu.memory_space<vmem>>, vector<1x1xf32>
    %18 = vector.broadcast %17 : vector<1x1xf32> to vector<1x2xf32>
    %19 = arith.addf %16, %18 : vector<1x2xf32>
    %c0_14 = arith.constant 0 : index
    %c0_15 = arith.constant 0 : index
    %20 = vector.load %arg8[%c0_14, %c0_15] : memref<1x2xf32, #tpu.memory_space<vmem>>, vector<1x2xf32>
    tpu.vector_store %arg8[%c0_14, %c0_15], %19 {strides = array<i32>} : memref<1x2xf32, #tpu.memory_space<vmem>>, vector<1x2xf32>,
    return
  }
  func.func @transform_0(%arg0: i32) -> (i32, i32) {
    %c0_i32 = arith.constant 0 : i32
    %c0_i32_0 = arith.constant 0 : i32
    return %c0_i32, %arg0 : i32, i32
  }
  func.func @transform_1(%arg0: i32) -> (i32, i32) {
    %c0_i32 = arith.constant 0 : i32
    %c0_i32_0 = arith.constant 0 : i32
    %c0_i32_1 = arith.constant 0 : i32
    return %c0_i32, %c0_i32_0 : i32, i32
  }
  func.func @transform_2(%arg0: i32) -> (i32, i32) {
    %c0_i32 = arith.constant 0 : i32
    %c0_i32_0 = arith.constant 0 : i32
    %c0_i32_1 = arith.constant 0 : i32
    return %c0_i32, %c0_i32_0 : i32, i32
  }
  func.func @transform_3(%arg0: i32) -> (i32, i32) {
    %c0_i32 = arith.constant 0 : i32
    %c0_i32_0 = arith.constant 0 : i32
    %c0_i32_1 = arith.constant 0 : i32
    return %c0_i32, %c0_i32_0 : i32, i32
  }
  func.func @transform_4(%arg0: i32) -> (i32, i32) {
    %c0_i32 = arith.constant 0 : i32
    %c0_i32_0 = arith.constant 0 : i32
    %c0_i32_1 = arith.constant 0 : i32
    return %c0_i32, %c0_i32_0 : i32, i32
  }
  func.func @transform_5(%arg0: i32) -> (i32, i32) {
    %c0_i32 = arith.constant 0 : i32
    %c0_i32_0 = arith.constant 0 : i32
    %c0_i32_1 = arith.constant 0 : i32
    return %c0_i32, %c0_i32_0 : i32, i32
  }
  func.func @transform_6(%arg0: i32) -> (i32, i32) {
    %c0_i32 = arith.constant 0 : i32
    %c0_i32_0 = arith.constant 0 : i32
    %c0_i32_1 = arith.constant 0 : i32
    return %c0_i32, %c0_i32_0 : i32, i32
  }
  func.func @transform_7(%arg0: i32) -> (i32, i32) {
    %c0_i32 = arith.constant 0 : i32
    %c0_i32_0 = arith.constant 0 : i32
    return %c0_i32, %arg0 : i32, i32
  }
}

</mosaic_0001>

<bundles_post_ra>
// kernel: tpu_custom_call.1
= control target key start
LH: loop header
LB: loop body
LE: loop exit
PB: predicated region body
PF: predicated region fallthrough
CT: control target
= control target key end

     0   :  { %s495_s0 = inlined_call_operand.vmem [shape: f32[1,2], index: 0, kind: input, shape index: {}]   ;;  %s496_s1 = inlined_call_operand.vmem [shape: f32[20,1], index: 1, kind: input, shape index: {}]   ;;  %s497_s2 = inlined_call_operand.vmem [shape: f32[20,1], index: 2, kind: input, shape index: {}]   ;;  %s498_s3 = inlined_call_operand.vmem [shape: f32[20,20], index: 3, kind: input, shape index: {}]   ;;  %s499_s4 = inlined_call_operand.vmem [shape: f32[20,1], index: 4, kind: input, shape index: {}]   ;;  %s500_s5 = inlined_call_operand.vmem [shape: f32[1,20], index: 5, kind: input, shape index: {}]   ;;  %s501_s6 = inlined_call_operand.<no memory space> [shape: f32[1,1], index: 6, kind: input, shape index: {}]   ;;  %s502_s7 = inlined_call_operand.hbm [shape: f32[1,2], index: 7, kind: output, shape index: {}]  }
   0x1   :  { %v12_v0 = vstv %s501_s6 }
   0x2   :  { %13 = vst [vmem:[#allocation2] sm:$0x1] %v12_v0 }
   0x3   :  { %v59_v1 = vld [vmem:[%s497_s2 + $0x10] sm:$0xf]  ;;  %v383_v3 = vmov 0   ;;  %v31_v4 = vld [vmem:[%s496_s1 + $0x8] sm:$0xff]  ;;  %v30_v5 = vld [vmem:[%s496_s1] sm:$0xff] }
   0x4   :  { %v32_v2 = vld [vmem:[%s496_s1 + $0x10] sm:$0xf]  ;;  %348 = vset.pattern.permute.xlu1 %v383_v3  ;;  %347 = vset.pattern.permute.xlu0 %v383_v3 }
   0x5   :  { %72 = vperm.xlu1 %348, %v59_v1   ;;  %45 = vperm.xlu0 %347, %v32_v2  }
   0x6   :  { %14 = vsyncpa [#allocation4], 0  ;;  %v58_v6 = vld [vmem:[%s497_s2 + $0x8] sm:$0xff]  ;;  %v57_v7 = vld [vmem:[%s497_s2] sm:$0xff]  ;;  %v384_v12 = vmov 0.0   ;;  %vm385_vm0 = vmmov 0   ;;  %v206_v48 = vlaneseq }
   0x7   :  { %v86_v8 = vld [vmem:[%s499_s4 + $0x10] sm:$0xf]  ;;  %v85_v9 = vld [vmem:[%s499_s4 + $0x8] sm:$0xff]  ;;  %v84_v10 = vld [vmem:[%s499_s4] sm:$0xff]  ;;  %319 = vmatprep.subr.mxu0 %v384_v12  ;;  %334 = vmatprep.subr.mxu1 %v384_v12  ;;  %vm112_vm1 = vcmask 1043456   ;;  %vm102_vm2 = vcmask 162816  }
   0x8   :  { %325 = vmatprep.mubr.msk.f32.mxu0 %vm385_vm0, %v384_v12  ;;  %340 = vmatprep.mubr.msk.f32.mxu1 %vm385_vm0, %v384_v12  ;;  %v302_v13 = vld [vmem:[%s495_s0] ss:$0 sm:$0xff]  ;;  %v82_v30 = vld [vmem:[%s498_s3 + $0x8] sm:$0xff]  ;;  %v83_v31 = vld [vmem:[%s498_s3 + $0x10] sm:$0xf]  ;;  %v207_v49 = vshrl.u32 %v206_v48, 7 }
   0x9   :  { %40 = vperm.xlu0 %347, %v31_v4   ;;  %35 = vperm.xlu1 %348, %v30_v5   ;;  %v200_v11 = vld [vmem:[#allocation2] sm:$0x1]  ;;  %s386_s25 = smov [#allocation3]   ;;  %vm286_vm3 = vcmask 8192  }
   0xa   :  { %v81_v28 = vld [vmem:[%s498_s3] sm:$0xff]  ;;  %v208_v50 = vsub.s32 0, %v207_v49  ;;  %s294_s26 = sshll.u32 %s386_s25, 4  ;;  %s295_s26 = int_to_ptr.vmem [resolvable:$true] %s294_s26 }
   0xb   :  { %v199_v46 = vld [vmem:[%s500_s5] sm:$0x1]  ;;  %s361_s5 = scalar_lea.vmem %s295_s26, 16  ;;  %s365_s27 = scalar_lea.vmem %s295_s26, 32 }
   0xc   :  { %p362_p0 = scmp.ne.s32.totalorder %s295_s26, %s361_s5  ;;  %p366_p1 = scmp.lt.s32.totalorder %s295_s26, %s295_s26 }
   0xd   :  { %67 = vperm.xlu0 %347, %v58_v6   ;;  %62 = vperm.xlu1 %348, %v57_v7   ;;  %p367_p2 = scmp.lt.s32.totalorder %s365_s27, %s361_s5 }
   0xf   :  { %p368_p3 = por %p367_p2, %p366_p1 }
  0x11   :  { %99 = vperm.xlu0 %347, %v86_v8   ;;  %94 = vperm.xlu1 %348, %v85_v9   ;;  %p369_p4 = pnand %p368_p3, %p362_p0 }
  0x15   :  { %89 = vperm.xlu0 %347, %v84_v10   ;;  %203 = vperm.xlu1 %348, %v200_v11  }
  0x80   :  { %v73_v14 = vpop.permute.xlu1 %72  ;;  %v46_v15 = vpop.permute.xlu0 %45 }
  0x81   :  { %v56_v16 = vmul.f32 %v302_v13, %v46_v15 }
  0x83   :  { %v77_v17 = vadd.f32 %v73_v14, %v56_v16 }
  0x84   :  { %v41_v18 = vpop.permute.xlu0 %40  ;;  %v36_v19 = vpop.permute.xlu1 %35 }
  0x85   :  { %349 = vtanh.f32 %v77_v17  ;;  %v55_v20 = vmul.f32 %v302_v13, %v41_v18  ;;  %v54_v21 = vmul.f32 %v302_v13, %v36_v19 }
  0x88   :  { %v68_v22 = vpop.permute.xlu0 %67  ;;  %v63_v23 = vpop.permute.xlu1 %62 }
  0x89   :  { %v76_v24 = vadd.f32 %v68_v22, %v55_v20  ;;  %v75_v25 = vadd.f32 %v63_v23, %v54_v21 }
  0x8b   :  { %351 = vtanh.f32 %v76_v24 }
  0x8c   :  { %353 = vtanh.f32 %v75_v25  ;;  %v100_v34 = vpop.permute.xlu0 %99  ;;  %v95_v37 = vpop.permute.xlu1 %94 }
  0x90   :  { %v90_v41 = vpop.permute.xlu0 %89  ;;  %v204_v51 = vpop.permute.xlu1 %203 }
  0x91   :  { %v209_v52 = vrot.slane %v204_v51, %v208_v50 }
  0x92   :  { %v350_v26 = vpop.eup %349 }
  0x93   :  { %320 = vmatpush3.msk.msra.mxu0 %vm112_vm1, %v350_v26 }
  0x94   :  { %321 = vmatprep.subr.mxu0 %v384_v12 }
  0x98   :  { %v352_v27 = vpop.eup %351 }
  0x99   :  { %322 = vmatpush3.msra.mxu0 %v352_v27  ;;  %v354_v29 = vpop.eup %353 }
  0x9a   :  { %323 = vmatprep.subr.mxu0 %v384_v12 }
  0x9b   :  { %324 = vmatpush3.msra.mxu0 %v354_v29 }
  0x9c   :  { %326 = vmatmul.mubr.msk.f32.vlgmr.msra.gmra.mxu0 %vm102_vm2, %v81_v28 }
  0x9d   :  { %328 = vmatprep.mubr.msk.f32.mxu0 %vm385_vm0, %v384_v12 }
  0xa0   :  { %329 = vmatmul.mubr.msk.f32.gmra.mxu0 %vm102_vm2, %v82_v30 }
  0xa1   :  { %331 = vmatprep.mubr.msk.f32.mxu0 %vm385_vm0, %v384_v12 }
  0xa4   :  { %332 = vmatmul.mubr.msk.f32.gmra.mxu0 %vm102_vm2, %v83_v31 }
 0x15c   :  { %v182_v32 = vpop.f32.mrf.mxu0 }
 0x15d   :  { %v183_v43 = vadd.f32 %v182_v32, %v90_v41 }
 0x15e   :  { %v327_v33 = vpop.f32.mrf.mxu0 }
 0x160   :  { %v187_v35 = vpop.f32.mrf.mxu0 }
 0x161   :  { %v188_v39 = vadd.f32 %v187_v35, %v95_v37 }
 0x162   :  { %v330_v36 = vpop.f32.mrf.mxu0 }
 0x164   :  { %v192_v38 = vpop.f32.mrf.mxu0 }
 0x165   :  { %v193_v40 = vadd.f32 %v192_v38, %v100_v34 }
 0x166   :  { %v333_v42 = vpop.f32.mrf.mxu0 }
 0x167   :  { %355 = vtanh.f32 %v193_v40 }
 0x168   :  { %357 = vtanh.f32 %v188_v39 }
 0x169   :  { %359 = vtanh.f32 %v183_v43 }
 0x174   :  { %v356_v44 = vpop.eup %355 }
 0x175   :  { %335 = vmatpush3.msk.msra.mxu1 %vm112_vm1, %v356_v44  ;;  %v358_v45 = vpop.eup %357 }
 0x176   :  { %336 = vmatprep.subr.mxu1 %v384_v12  ;;  %v360_v47 = vpop.eup %359 }
 0x177   :  { %337 = vmatpush3.msra.mxu1 %v358_v45 }
 0x178   :  { %338 = vmatprep.subr.mxu1 %v384_v12 }
 0x179   :  { %339 = vmatpush3.msra.mxu1 %v360_v47 }
 0x17a   :  { %341 = vmatmul.mubr.msk.f32.vlgmr.msra.gmra.mxu1 %vm102_vm2, %v199_v46 }
 0x23a   :  { %v282_v53 = vpop.f32.mrf.mxu1 }
 0x23b   :  { %v283_v54 = vadd.f32 %v282_v53, %v209_v52 }
 0x23c   :  { %v342_v55 = vpop.f32.mrf.mxu1 }
 0x23d   :  { %287 = vst.msk [vmem:[#allocation3] sm:$0x1] %vm286_vm3, %v283_v54 }
 0x23e   :  { %372 = shalt.err (!%p369_p4)
}
 0x23f   :  { %297 = dma.vmem_to_hbm [thread:$0]  %s295_s26, 16, %s502_s7, [#allocation4]  }
 0x240   :  { %381 = dma.done.wait [#allocation4], 16  }
 0x241   :  { %382 = vsyncadd [#allocation4], 4294967280 }
 0x242   :  { %301 = vsyncpa [#allocation4], 1 }

</bundles_post_ra>
